<compile_context>
chip_gen: v7x
topology: tpu7x:2x2x1
jax: 0.10.0
libtpu: 0.0.40
codegen_flags: <defaults>
</compile_context>

<pallas_src>
import functools

import jax
import jax.numpy as jnp
from jax.experimental import pallas as pl
from jax.experimental.pallas import tpu as pltpu


def _cdiv(a, b):
    return (a + b - 1) // b


def _round_up(a, b):
    return _cdiv(a, b) * b


def _tensorcores_per_chip():
    # v7x exposes 2 TensorCores per chip; v5e/v6e have 1.  Best-effort
    # detection; falling back to 1 is always correct (just no megacore split
    # for mid-size batches).
    try:
        kind = jax.devices()[0].device_kind.lower()
    except Exception:
        return 1
    return 2 if ("v7" in kind or "7x" in kind) else 1


def _tanhshrink(v):
    # torch.nn.Tanhshrink: x - tanh(x)   (tanh runs on the EUP)
    return v - jnp.tanh(v)


def mlp_kernel(x_ref, w1_ref, b1_ref, w2_ref, b2_ref, w3_ref, b3_ref,
               w4t_ref, b4_ref, o_ref):
    # x_ref: (bb, F) native layout (optionally bf16).  All math in f32.
    # Activations are carried as (features, bb): batch on the lane axis, so
    # every VPU/EUP op and the output store are lane-dense.
    x = x_ref[...].astype(jnp.float32)

    # fc1: contract (64, F) with (bb, F) over F  ->  (64, bb)   (A @ B^T form)
    h = jax.lax.dot_general(
        w1_ref[...], x, (((1,), (1,)), ((), ())),
        preferred_element_type=jnp.float32) + b1_ref[...]
    h = _tanhshrink(h)

    # fc2: (32, 64) @ (64, bb)
    h = jnp.dot(w2_ref[...], h, preferred_element_type=jnp.float32) + b2_ref[...]
    h = _tanhshrink(h)

    # fc3: (16, 32) @ (32, bb)
    h = jnp.dot(w3_ref[...], h, preferred_element_type=jnp.float32) + b3_ref[...]
    h = _tanhshrink(h)

    # fc4 (out_features == 1): 16-term multiply-add on the VPU + sublane
    # reduce on the XLU instead of an M=1 MXU matmul.
    o = jnp.sum(w4t_ref[...] * h, axis=0, keepdims=True) + b4_ref[...]
    o_ref[...] = o.astype(o_ref.dtype)


@functools.partial(jax.jit, static_argnames=("block_b", "use_bf16"))
def price_predictor(x, params, block_b=8192, use_bf16=False):
    """x: (B, input_size) float32.  params: PyTorch-layout weights (out, in),
    biases stored as (out, 1).  Returns (B, 1) float32."""
    B, F = x.shape

    # Batch tile: multiple of 128 (lane width).  Big tiles amortize the fixed
    # per-grid-step cost; only split mid-size batches on dual-TC chips (v7x).
    bb = max(128, min(_round_up(block_b, 128), _round_up(B, 128)))
    ncores = _tensorcores_per_chip()
    if ncores > 1:
        bb = min(bb, max(128, _round_up(_cdiv(B, ncores), 128)))
    num_tiles = _cdiv(B, bb)
    bp = num_tiles * bb                      # padded output length (lane axis)

    in_dtype = jnp.bfloat16 if use_bf16 else jnp.float32
    in_bytes = 2 if use_bf16 else 4
    xin = x.astype(in_dtype)                 # no transpose / pad of x

    w1 = params["w1"].astype(jnp.float32)
    w2 = params["w2"].astype(jnp.float32)
    w3 = params["w3"].astype(jnp.float32)
    w4t = params["w4"].astype(jnp.float32).reshape(-1, 1)     # (16, 1)
    b1 = params["b1"].astype(jnp.float32)
    b2 = params["b2"].astype(jnp.float32)
    b3 = params["b3"].astype(jnp.float32)
    b4 = params["b4"].astype(jnp.float32)

    def full(arr):
        # whole-array block; same block index every grid step (grid-invariant)
        return pl.BlockSpec(arr.shape, lambda i: (0, 0))

    # Scoped-VMEM budget: double-buffered x tile + output tile + f32 activation
    # temporaries (generous 6x headroom) + weights.  v5e's scoped default is
    # only 16 MiB; v7x has 64 MiB physical per TC so cap lower there.
    vmem_est = (2 * bb * F * in_bytes + 2 * bb * 4
                + 6 * (64 + 32 + 16 + 1) * bb * 4 + (1 << 20))
    vmem_cap = (48 << 20) if ncores > 1 else (96 << 20)
    vmem_limit = int(min(vmem_cap, max(32 << 20, vmem_est)))

    cost = pl.CostEstimate(
        flops=2 * (F * 64 + 64 * 32 + 32 * 16 + 16) * B,
        transcendentals=(64 + 32 + 16) * B,
        bytes_accessed=B * F * in_bytes + B * 4
        + 4 * (F * 64 + 64 * 32 + 32 * 16 + 16 + 64 + 32 + 16 + 1),
    )

    out = pl.pallas_call(
        mlp_kernel,
        out_shape=jax.ShapeDtypeStruct((1, bp), jnp.float32),
        grid_spec=pltpu.PrefetchScalarGridSpec(
            num_scalar_prefetch=0,
            grid=(num_tiles,),
            in_specs=[
                pl.BlockSpec((bb, F), lambda i: (i, 0)),   # x tile, native layout
                full(w1), full(b1),
                full(w2), full(b2),
                full(w3), full(b3),
                full(w4t), full(b4),
            ],
            # Lane-dense output: (1, bb) blocks with batch on the lane axis;
            # full blocks -> unmasked 128-lane stores.
            out_specs=pl.BlockSpec((1, bb), lambda i: (0, i)),
        ),
        compiler_params=pltpu.CompilerParams(
            dimension_semantics=("parallel",),
            vmem_limit_bytes=vmem_limit),
        cost_estimate=cost,
    )(xin, w1, b1, w2, b2, w3, b3, w4t, b4)

    return out[0, :B].reshape(B, 1)


def init_params(key, input_size):
    """Deterministic synthetic params in PyTorch nn.Linear layout:
    weight (out, in), bias stored as (out, 1)."""
    dims = [(input_size, 64), (64, 32), (32, 16), (16, 1)]
    params = {}
    for n, (din, dout) in enumerate(dims, start=1):
        key, kw, kb = jax.random.split(key, 3)
        bound = 1.0 / (din ** 0.5)   # matches torch Linear init range
        params[f"w{n}"] = jax.random.uniform(
            kw, (dout, din), jnp.float32, minval=-bound, maxval=bound)
        params[f"b{n}"] = jax.random.uniform(
            kb, (dout, 1), jnp.float32, minval=-bound, maxval=bound)
    return params


def reference_forward(x, params):
    # Pure-JAX reference matching torch semantics: y = x @ W.T + b
    h = x
    for n in range(1, 5):
        h = h @ params[f"w{n}"].T + params[f"b{n}"].T
        if n < 4:
            h = h - jnp.tanh(h)
    return h


if __name__ == "__main__":
    key = jax.random.PRNGKey(0)
    k_x, k_x2, k_p = jax.random.split(key, 3)

    input_size = 32
    params = init_params(k_p, input_size)

    # Small batch (single tile; padded output lanes sliced off).
    x = jax.random.normal(k_x, (8, input_size), jnp.float32)
    out = price_predictor(x, params)
    jax.block_until_ready(out)
    ref = reference_forward(x, params)
    assert out.shape == (8, 1)
    assert jnp.allclose(out, ref, atol=1e-4, rtol=1e-4)

    # Ragged batch with a small tile to exercise multiple grid steps + partial
    # input tail (no wrapper pad of x).
    x2 = jax.random.normal(k_x2, (300, input_size), jnp.float32)
    out2 = price_predictor(x2, params, block_b=128)
    jax.block_until_ready(out2)
    ref2 = reference_forward(x2, params)
    assert out2.shape == (300, 1)
    assert jnp.allclose(out2, ref2, atol=1e-4, rtol=1e-4)

    # bf16-input path: only x is bf16; weights and inter-layer activations f32.
    out3 = price_predictor(x2, params, use_bf16=True)
    jax.block_until_ready(out3)
    ref3 = reference_forward(x2.astype(jnp.bfloat16).astype(jnp.float32), params)
    assert out3.shape == (300, 1)
    assert jnp.allclose(out3, ref3, atol=2e-3, rtol=2e-3)

    print("KERNEL_OK")
</pallas_src>

<mosaic_0001>
module attributes {stable_mosaic.version = 11 : i64} {
  func.func @mlp_kernel(%arg0: i32, %arg1: memref<128x32xf32, #tpu.memory_space<vmem>>, %arg2: memref<64x32xf32, #tpu.memory_space<vmem>>, %arg3: memref<64x1xf32, #tpu.memory_space<vmem>>, %arg4: memref<32x64xf32, #tpu.memory_space<vmem>>, %arg5: memref<32x1xf32, #tpu.memory_space<vmem>>, %arg6: memref<16x32xf32, #tpu.memory_space<vmem>>, %arg7: memref<16x1xf32, #tpu.memory_space<vmem>>, %arg8: memref<16x1xf32, #tpu.memory_space<vmem>>, %arg9: memref<1x1xf32, #tpu.memory_space<vmem>>, %arg10: memref<1x128xf32, #tpu.memory_space<vmem>>) attributes {dimension_semantics = [#tpu.dimension_semantics<parallel>], iteration_bounds = array<i64: 1>, scalar_prefetch = 0 : i64, scratch_operands = 0 : i64, tpu.core_type = #tpu.core_type<tc>, window_params = [{transform_indices = @transform_0, window_bounds = array<i64: 128, 32>}, {pipeline_mode = #tpu.pipeline_mode<synchronous>, transform_indices = @transform_1, window_bounds = array<i64: 64, 32>}, {pipeline_mode = #tpu.pipeline_mode<synchronous>, transform_indices = @transform_2, window_bounds = array<i64: 64, 1>}, {pipeline_mode = #tpu.pipeline_mode<synchronous>, transform_indices = @transform_3, window_bounds = array<i64: 32, 64>}, {pipeline_mode = #tpu.pipeline_mode<synchronous>, transform_indices = @transform_4, window_bounds = array<i64: 32, 1>}, {pipeline_mode = #tpu.pipeline_mode<synchronous>, transform_indices = @transform_5, window_bounds = array<i64: 16, 32>}, {pipeline_mode = #tpu.pipeline_mode<synchronous>, transform_indices = @transform_6, window_bounds = array<i64: 16, 1>}, {pipeline_mode = #tpu.pipeline_mode<synchronous>, transform_indices = @transform_7, window_bounds = array<i64: 16, 1>}, {pipeline_mode = #tpu.pipeline_mode<synchronous>, transform_indices = @transform_8, window_bounds = array<i64: 1, 1>}, {transform_indices = @transform_9, window_bounds = array<i64: 1, 128>}]} {
    %c0 = arith.constant 0 : index
    %c0_0 = arith.constant 0 : index
    %0 = vector.load %arg1[%c0, %c0_0] : memref<128x32xf32, #tpu.memory_space<vmem>>, vector<128x32xf32>
    %c0_1 = arith.constant 0 : index
    %c0_2 = arith.constant 0 : index
    %1 = vector.load %arg2[%c0_1, %c0_2] : memref<64x32xf32, #tpu.memory_space<vmem>>, vector<64x32xf32>
    %cst = arith.constant dense<0.000000e+00> : vector<64x128xf32>
    %2 = tpu.matmul %1, %0, %cst {dimension_numbers = #tpu.dot_dimension_numbers<[1], [1], [0], [0], [0, 0, 1, 0], [], []>} : vector<64x32xf32>, vector<128x32xf32>, vector<64x128xf32> -> vector<64x128xf32>
    %c0_3 = arith.constant 0 : index
    %c0_4 = arith.constant 0 : index
    %3 = vector.load %arg3[%c0_3, %c0_4] : memref<64x1xf32, #tpu.memory_space<vmem>>, vector<64x1xf32>
    %4 = vector.broadcast %3 : vector<64x1xf32> to vector<64x128xf32>
    %5 = arith.addf %2, %4 : vector<64x128xf32>
    %6 = math.tanh %5 : vector<64x128xf32>
    %7 = arith.subf %5, %6 : vector<64x128xf32>
    %c0_5 = arith.constant 0 : index
    %c0_6 = arith.constant 0 : index
    %8 = vector.load %arg4[%c0_5, %c0_6] : memref<32x64xf32, #tpu.memory_space<vmem>>, vector<32x64xf32>
    %cst_7 = arith.constant dense<0.000000e+00> : vector<32x128xf32>
    %9 = tpu.matmul %8, %7, %cst_7 {dimension_numbers = #tpu.dot_dimension_numbers<[1], [0], [0], [1], [0, 0, 1, 1], [], []>} : vector<32x64xf32>, vector<64x128xf32>, vector<32x128xf32> -> vector<32x128xf32>
    %c0_8 = arith.constant 0 : index
    %c0_9 = arith.constant 0 : index
    %10 = vector.load %arg5[%c0_8, %c0_9] : memref<32x1xf32, #tpu.memory_space<vmem>>, vector<32x1xf32>
    %11 = vector.broadcast %10 : vector<32x1xf32> to vector<32x128xf32>
    %12 = arith.addf %9, %11 : vector<32x128xf32>
    %13 = math.tanh %12 : vector<32x128xf32>
    %14 = arith.subf %12, %13 : vector<32x128xf32>
    %c0_10 = arith.constant 0 : index
    %c0_11 = arith.constant 0 : index
    %15 = vector.load %arg6[%c0_10, %c0_11] : memref<16x32xf32, #tpu.memory_space<vmem>>, vector<16x32xf32>
    %cst_12 = arith.constant dense<0.000000e+00> : vector<16x128xf32>
    %16 = tpu.matmul %15, %14, %cst_12 {dimension_numbers = #tpu.dot_dimension_numbers<[1], [0], [0], [1], [0, 0, 1, 1], [], []>} : vector<16x32xf32>, vector<32x128xf32>, vector<16x128xf32> -> vector<16x128xf32>
    %c0_13 = arith.constant 0 : index
    %c0_14 = arith.constant 0 : index
    %17 = vector.load %arg7[%c0_13, %c0_14] : memref<16x1xf32, #tpu.memory_space<vmem>>, vector<16x1xf32>
    %18 = vector.broadcast %17 : vector<16x1xf32> to vector<16x128xf32>
    %19 = arith.addf %16, %18 : vector<16x128xf32>
    %20 = math.tanh %19 : vector<16x128xf32>
    %21 = arith.subf %19, %20 : vector<16x128xf32>
    %c0_15 = arith.constant 0 : index
    %c0_16 = arith.constant 0 : index
    %22 = vector.load %arg8[%c0_15, %c0_16] : memref<16x1xf32, #tpu.memory_space<vmem>>, vector<16x1xf32>
    %23 = vector.broadcast %22 : vector<16x1xf32> to vector<16x128xf32>
    %24 = arith.mulf %23, %21 : vector<16x128xf32>
    %cst_17 = arith.constant dense<0.000000e+00> : vector<128xf32>
    %25 = vector.multi_reduction <add>, %24, %cst_17 [0] : vector<16x128xf32> to vector<128xf32>
    %26 = vector.shape_cast %25 : vector<128xf32> to vector<1x128xf32>
    %c0_18 = arith.constant 0 : index
    %c0_19 = arith.constant 0 : index
    %27 = vector.load %arg9[%c0_18, %c0_19] : memref<1x1xf32, #tpu.memory_space<vmem>>, vector<1x1xf32>
    %28 = vector.broadcast %27 : vector<1x1xf32> to vector<1x128xf32>
    %29 = arith.addf %26, %28 : vector<1x128xf32>
    %c0_20 = arith.constant 0 : index
    %c0_21 = arith.constant 0 : index
    %30 = vector.load %arg10[%c0_20, %c0_21] : memref<1x128xf32, #tpu.memory_space<vmem>>, vector<1x128xf32>
    tpu.vector_store %arg10[%c0_20, %c0_21], %29 {strides = array<i32>} : memref<1x128xf32, #tpu.memory_space<vmem>>, vector<1x128xf32>,
    return
  }
  func.func @transform_0(%arg0: i32) -> (i32, i32) {
    %c0_i32 = arith.constant 0 : i32
    %c0_i32_0 = arith.constant 0 : i32
    return %arg0, %c0_i32 : i32, i32
  }
  func.func @transform_1(%arg0: i32) -> (i32, i32) {
    %c0_i32 = arith.constant 0 : i32
    %c0_i32_0 = arith.constant 0 : i32
    %c0_i32_1 = arith.constant 0 : i32
    return %c0_i32, %c0_i32_0 : i32, i32
  }
  func.func @transform_2(%arg0: i32) -> (i32, i32) {
    %c0_i32 = arith.constant 0 : i32
    %c0_i32_0 = arith.constant 0 : i32
    %c0_i32_1 = arith.constant 0 : i32
    return %c0_i32, %c0_i32_0 : i32, i32
  }
  func.func @transform_3(%arg0: i32) -> (i32, i32) {
    %c0_i32 = arith.constant 0 : i32
    %c0_i32_0 = arith.constant 0 : i32
    %c0_i32_1 = arith.constant 0 : i32
    return %c0_i32, %c0_i32_0 : i32, i32
  }
  func.func @transform_4(%arg0: i32) -> (i32, i32) {
    %c0_i32 = arith.constant 0 : i32
    %c0_i32_0 = arith.constant 0 : i32
    %c0_i32_1 = arith.constant 0 : i32
    return %c0_i32, %c0_i32_0 : i32, i32
  }
  func.func @transform_5(%arg0: i32) -> (i32, i32) {
    %c0_i32 = arith.constant 0 : i32
    %c0_i32_0 = arith.constant 0 : i32
    %c0_i32_1 = arith.constant 0 : i32
    return %c0_i32, %c0_i32_0 : i32, i32
  }
  func.func @transform_6(%arg0: i32) -> (i32, i32) {
    %c0_i32 = arith.constant 0 : i32
    %c0_i32_0 = arith.constant 0 : i32
    %c0_i32_1 = arith.constant 0 : i32
    return %c0_i32, %c0_i32_0 : i32, i32
  }
  func.func @transform_7(%arg0: i32) -> (i32, i32) {
    %c0_i32 = arith.constant 0 : i32
    %c0_i32_0 = arith.constant 0 : i32
    %c0_i32_1 = arith.constant 0 : i32
    return %c0_i32, %c0_i32_0 : i32, i32
  }
  func.func @transform_8(%arg0: i32) -> (i32, i32) {
    %c0_i32 = arith.constant 0 : i32
    %c0_i32_0 = arith.constant 0 : i32
    %c0_i32_1 = arith.constant 0 : i32
    return %c0_i32, %c0_i32_0 : i32, i32
  }
  func.func @transform_9(%arg0: i32) -> (i32, i32) {
    %c0_i32 = arith.constant 0 : i32
    %c0_i32_0 = arith.constant 0 : i32
    return %c0_i32, %arg0 : i32, i32
  }
}

</mosaic_0001>

<bundles_post_ra>
// kernel: price_predictor.1
= control target key start
LH: loop header
LB: loop body
LE: loop exit
PB: predicated region body
PF: predicated region fallthrough
CT: control target
= control target key end

     0   :  { %vm106_vm0 = vcmask 261120   ;;  %v822_v3 = vmov 0   ;;  %vm328_vm2 = vcmask 523264   ;;  %s1069_s0 = inlined_call_operand.vmem [shape: f32[8,32], index: 0, kind: input, shape index: {}]   ;;  %s1070_s8 = inlined_call_operand.<no memory space> [shape: f32[1,1], index: 8, kind: input, shape index: {}]   ;;  %s1071_s1 = inlined_call_operand.vmem [shape: f32[64,32], index: 1, kind: input, shape index: {}]   ;;  %s1072_s2 = inlined_call_operand.vmem [shape: f32[64,1], index: 2, kind: input, shape index: {}]   ;;  %s1073_s4 = inlined_call_operand.vmem [shape: f32[32,1], index: 4, kind: input, shape index: {}]   ;;  %s1074_s6 = inlined_call_operand.vmem [shape: f32[16,1], index: 6, kind: input, shape index: {}]   ;;  %s1075_s7 = inlined_call_operand.vmem [shape: f32[16,1], index: 7, kind: input, shape index: {}]   ;;  %s1076_s3 = inlined_call_operand.vmem [shape: f32[32,64], index: 3, kind: input, shape index: {}]   ;;  %s1077_s5 = inlined_call_operand.vmem [shape: f32[16,32], index: 5, kind: input, shape index: {}]   ;;  %s1078_s9 = inlined_call_operand.vmem [shape: f32[1,128], index: 9, kind: output, shape index: {}]  }
   0x1   :  { %v34_v0 = vld [vmem:[%s1069_s0] sm:$0xff]  ;;  %v35_v1 = vld [vmem:[%s1069_s0 + $0x8] sm:$0xff]  ;;  %vm881_vm1 = vmpackc.low %vm106_vm0, %vm106_vm0  ;;  %792 = vset.pattern.permute.xlu0 %v822_v3  ;;  %793 = vset.pattern.permute.xlu1 %v822_v3  ;;  %v14_v4 = vstv %s1070_s8 }
   0x2   :  { %v719_v5 = vpack.c.bf16 %v35_v1, %v34_v0  ;;  %v36_v6 = vld [vmem:[%s1069_s0 + $0x10] sm:$0xff]  ;;  %v37_v7 = vld [vmem:[%s1069_s0 + $0x18] sm:$0xff]  ;;  %15 = vst [vmem:[#allocation2] sm:$0x1] %v14_v4  ;;  %v50_v9 = vld [vmem:[%s1071_s1] sm:$0xff] }
   0x3   :  { %v725_v8 = vpack.c.bf16 %v37_v7, %v36_v6  ;;  %v38_v10 = vld [vmem:[%s1069_s0 + $0x20] sm:$0xff]  ;;  %v39_v11 = vld [vmem:[%s1069_s0 + $0x28] sm:$0xff]  ;;  %674 = vmatprep.mubr.msk.f32.mxu0 %vm106_vm0, %v50_v9  ;;  %v60_v14 = vld [vmem:[%s1072_s2 + $0x10] sm:$0xff] }
   0x4   :  { %721 = vmatprep.subr.msk.bf16.mxu0 %vm881_vm1, %v719_v5  ;;  %v58_v12 = vld [vmem:[%s1072_s2] sm:$0xff]  ;;  %v731_v13 = vpack.c.bf16 %v39_v11, %v38_v10  ;;  %v59_v15 = vld [vmem:[%s1072_s2 + $0x8] sm:$0xff]  ;;  %78 = vperm.xlu1 %793, %v60_v14   ;;  %v61_v16 = vld [vmem:[%s1072_s2 + $0x18] sm:$0xff] }
   0x5   :  { %724 = vmatpush3.bf16.xpose.msk.msra.mxu0 %vm881_vm1, %v719_v5  ;;  %68 = vperm.xlu0 %792, %v58_v12   ;;  %v40_v17 = vld [vmem:[%s1069_s0 + $0x30] sm:$0xff]  ;;  %v41_v18 = vld [vmem:[%s1069_s0 + $0x38] sm:$0xff]  ;;  %v62_v19 = vld [vmem:[%s1072_s2 + $0x20] sm:$0xff] }
   0x6   :  { %727 = vmatprep.subr.msk.bf16.mxu0 %vm881_vm1, %v725_v8  ;;  %v63_v20 = vld [vmem:[%s1072_s2 + $0x28] sm:$0xff]  ;;  %v737_v21 = vpack.c.bf16 %v41_v18, %v40_v17  ;;  %v64_v22 = vld [vmem:[%s1072_s2 + $0x30] sm:$0xff]  ;;  %v65_v23 = vld [vmem:[%s1072_s2 + $0x38] sm:$0xff] }
   0x7   :  { %v42_v24 = vld [vmem:[%s1069_s0 + $0x40] sm:$0xff]  ;;  %v43_v25 = vld [vmem:[%s1069_s0 + $0x48] sm:$0xff]  ;;  %v306_v29 = vld [vmem:[%s1073_s4 + $0x10] sm:$0xff] }
   0x8   :  { %83 = vperm.xlu1 %793, %v61_v16   ;;  %v304_v26 = vld [vmem:[%s1073_s4] sm:$0xff]  ;;  %v305_v27 = vld [vmem:[%s1073_s4 + $0x8] sm:$0xff]  ;;  %v743_v28 = vpack.c.bf16 %v43_v25, %v42_v24  ;;  %v307_v30 = vld [vmem:[%s1073_s4 + $0x18] sm:$0xff] }
   0x9   :  { %73 = vperm.xlu0 %792, %v59_v15   ;;  %v44_v31 = vld [vmem:[%s1069_s0 + $0x50] sm:$0xff]  ;;  %v45_v32 = vld [vmem:[%s1069_s0 + $0x58] sm:$0xff]  ;;  %v436_v33 = vld [vmem:[%s1074_s6] sm:$0xff] }
   0xa   :  { %v437_v34 = vld [vmem:[%s1074_s6 + $0x8] sm:$0xff]  ;;  %v749_v35 = vpack.c.bf16 %v45_v32, %v44_v31  ;;  %v533_v36 = vld [vmem:[%s1075_s7] sm:$0xff]  ;;  %v48_v42 = vld [vmem:[%s1069_s0 + $0x70] sm:$0xff] }
   0xb   :  { %v534_v37 = vld [vmem:[%s1075_s7 + $0x8] sm:$0xff]  ;;  %v46_v38 = vld [vmem:[%s1069_s0 + $0x60] sm:$0xff]  ;;  %v49_v43 = vld [vmem:[%s1069_s0 + $0x78] sm:$0xff] }
   0xc   :  { %93 = vperm.xlu1 %793, %v63_v20   ;;  %v47_v39 = vld [vmem:[%s1069_s0 + $0x68] sm:$0xff]  ;;  %v554_v40 = vld [vmem:[#allocation2] sm:$0x1]  ;;  %v761_v44 = vpack.c.bf16 %v49_v43, %v48_v42  ;;  %v52_v46 = vld [vmem:[%s1071_s1 + $0x10] sm:$0xff] }
   0xd   :  { %730 = vmatpush3.bf16.xpose.msk.msra.mxu0 %vm881_vm1, %v725_v8  ;;  %88 = vperm.xlu0 %792, %v62_v19   ;;  %v755_v41 = vpack.c.bf16 %v47_v39, %v46_v38  ;;  %v51_v45 = vld [vmem:[%s1071_s1 + $0x8] sm:$0xff]  ;;  %v53_v47 = vld [vmem:[%s1071_s1 + $0x18] sm:$0xff]  ;;  %v54_v48 = vld [vmem:[%s1071_s1 + $0x20] sm:$0xff] }
   0xe   :  { %733 = vmatprep.subr.msk.bf16.mxu0 %vm881_vm1, %v731_v13  ;;  %v55_v49 = vld [vmem:[%s1071_s1 + $0x28] sm:$0xff]  ;;  %v56_v50 = vld [vmem:[%s1071_s1 + $0x30] sm:$0xff]  ;;  %v57_v51 = vld [vmem:[%s1071_s1 + $0x38] sm:$0xff] }
   0xf   :  { %v300_v52 = vld [vmem:[%s1076_s3] sm:$0xff] }
  0x10   :  { %103 = vperm.xlu1 %793, %v65_v23   ;;  %702 = vmatprep.mubr.msk.f32.mxu1 %vm328_vm2, %v300_v52 }
  0x11   :  { %98 = vperm.xlu0 %792, %v64_v22  }
  0x14   :  { %315 = vperm.xlu1 %793, %v305_v27  }
  0x15   :  { %736 = vmatpush3.bf16.xpose.msk.msra.mxu0 %vm881_vm1, %v731_v13  ;;  %310 = vperm.xlu0 %792, %v304_v26  }
  0x16   :  { %739 = vmatprep.subr.msk.bf16.mxu0 %vm881_vm1, %v737_v21 }
  0x18   :  { %325 = vperm.xlu1 %793, %v307_v30  }
  0x19   :  { %320 = vperm.xlu0 %792, %v306_v29  }
  0x1c   :  { %445 = vperm.xlu1 %793, %v437_v34   ;;  %v302_v34 = vld [vmem:[%s1076_s3 + $0x10] sm:$0xff] }
  0x1d   :  { %742 = vmatpush3.bf16.xpose.msk.msra.mxu0 %vm881_vm1, %v737_v21  ;;  %440 = vperm.xlu0 %792, %v436_v33   ;;  %v301_v33 = vld [vmem:[%s1076_s3 + $0x8] sm:$0xff] }
  0x1e   :  { %745 = vmatprep.subr.msk.bf16.mxu0 %vm881_vm1, %v743_v28 }
  0x20   :  { %542 = vperm.xlu1 %793, %v534_v37  }
  0x21   :  { %537 = vperm.xlu0 %792, %v533_v36   ;;  %v434_v36 = vld [vmem:[%s1077_s5] sm:$0xff] }
  0x25   :  { %748 = vmatpush3.bf16.xpose.msk.msra.mxu0 %vm881_vm1, %v743_v28  ;;  %557 = vperm.xlu0 %792, %v554_v40  }
  0x26   :  { %751 = vmatprep.subr.msk.bf16.mxu0 %vm881_vm1, %v749_v35 }
  0x2d   :  { %754 = vmatpush3.bf16.xpose.msk.msra.mxu0 %vm881_vm1, %v749_v35  ;;  %v303_v35 = vld [vmem:[%s1076_s3 + $0x18] sm:$0xff] }
  0x2e   :  { %757 = vmatprep.subr.msk.bf16.mxu0 %vm881_vm1, %v755_v41 }
  0x35   :  { %760 = vmatpush3.bf16.xpose.msk.msra.mxu0 %vm881_vm1, %v755_v41 }
  0x36   :  { %763 = vmatprep.subr.msk.bf16.mxu0 %vm881_vm1, %v761_v44 }
  0x3d   :  { %766 = vmatpush3.bf16.xpose.msk.msra.mxu0 %vm881_vm1, %v761_v44 }
  0x44   :  { %675 = vmatmul.mubr.msk.f32.vlgmr.msra.gmra.mrb[0].mxu0 %vm106_vm0, %v51_v45 }
  0x45   :  { %677 = vmatprep.mubr.msk.f32.mxu0 %vm106_vm0, %v52_v46 }
  0x48   :  { %678 = vmatmul.mubr.msk.f32.gmra.mrb[2].mxu0 %vm106_vm0, %v53_v47 }
  0x49   :  { %680 = vmatprep.mubr.msk.f32.mxu0 %vm106_vm0, %v54_v48 }
  0x4c   :  { %681 = vmatmul.mubr.msk.f32.gmra.mrb[4].mxu0 %vm106_vm0, %v55_v49 }
  0x4d   :  { %683 = vmatprep.mubr.msk.f32.mxu0 %vm106_vm0, %v56_v50 }
  0x50   :  { %684 = vmatmul.mubr.msk.f32.gmra.mrb[6].mxu0 %vm106_vm0, %v57_v51 }
  0x83   :  { %v79_v54 = vpop.permute.xlu1 %78 }
  0x84   :  { %v69_v53 = vpop.permute.xlu0 %68 }
  0x87   :  { %v84_v56 = vpop.permute.xlu1 %83 }
  0x88   :  { %v74_v55 = vpop.permute.xlu0 %73 }
  0x8b   :  { %v94_v0 = vpop.permute.xlu1 %93 }
  0x8c   :  { %v89_v2 = vpop.permute.xlu0 %88 }
  0x8f   :  { %v104_v7 = vpop.permute.xlu1 %103 }
  0x90   :  { %v99_v10 = vpop.permute.xlu0 %98 }
  0x93   :  { %v316_v37 = vpop.permute.xlu1 %315 }
  0x94   :  { %v311_v38 = vpop.permute.xlu0 %310 }
  0x97   :  { %v326_v43 = vpop.permute.xlu1 %325 }
  0x98   :  { %v321_v45 = vpop.permute.xlu0 %320 }
 0x117   :  { %v676_v57 = vpop.f32.mrb[0].mxu0 }
 0x118   :  { %v251_v58 = vadd.f32 %v676_v57, %v74_v55  ;;  %v245_v59 = vpop.f32.mrb[1].mxu0 }
 0x119   :  { %v246_v60 = vadd.f32 %v245_v59, %v69_v53  ;;  %v435_v59 = vld [vmem:[%s1077_s5 + $0x8] sm:$0xff] }
 0x11a   :  { %794 = vtanh.f32 %v251_v58 }
 0x11b   :  { %796 = vtanh.f32 %v246_v60  ;;  %v679_v61 = vpop.f32.mrb[2].mxu0 }
 0x11c   :  { %v261_v62 = vadd.f32 %v679_v61, %v84_v56  ;;  %v255_v63 = vpop.f32.mrb[3].mxu0 }
 0x11d   :  { %v256_v1 = vadd.f32 %v255_v63, %v79_v54 }
 0x11e   :  { %798 = vtanh.f32 %v261_v62 }
 0x11f   :  { %800 = vtanh.f32 %v256_v1  ;;  %v682_v3 = vpop.f32.mrb[4].mxu0 }
 0x120   :  { %v271_v4 = vadd.f32 %v682_v3, %v94_v0  ;;  %v265_v5 = vpop.f32.mrb[5].mxu0 }
 0x121   :  { %v266_v6 = vadd.f32 %v265_v5, %v89_v2 }
 0x122   :  { %802 = vtanh.f32 %v271_v4 }
 0x123   :  { %804 = vtanh.f32 %v266_v6  ;;  %v685_v8 = vpop.f32.mrb[6].mxu0 }
 0x124   :  { %v795_v9 = vpop.eup %794  ;;  %v281_v11 = vadd.f32 %v685_v8, %v104_v7  ;;  %v275_v12 = vpop.f32.mrb[7].mxu0 }
 0x125   :  { %v797_v13 = vpop.eup %796  ;;  %v293_v14 = vsub.f32 %v251_v58, %v795_v9  ;;  %v276_v15 = vadd.f32 %v275_v12, %v99_v10  ;;  %v560_v10 = vlaneseq }
 0x126   :  { %v292_v16 = vsub.f32 %v246_v60, %v797_v13  ;;  %806 = vtanh.f32 %v281_v11  ;;  %v446_v60 = vpop.permute.xlu1 %445 }
 0x127   :  { %808 = vtanh.f32 %v276_v15  ;;  %v561_v13 = vshrl.u32 %v560_v10, 7 }
 0x128   :  { %v799_v17 = vpop.eup %798  ;;  %v767_v18 = vpack.c.bf16 %v293_v14, %v292_v16 }
 0x129   :  { %v801_v19 = vpop.eup %800  ;;  %v295_v20 = vsub.f32 %v261_v62, %v799_v17  ;;  %v441_v62 = vpop.permute.xlu0 %440  ;;  %v562_v16 = vsub.s32 0, %v561_v13 }
 0x12a   :  { %v294_v21 = vsub.f32 %v256_v1, %v801_v19  ;;  %768 = vmatprep.subr.bf16.mxu1 %v767_v18  ;;  %v543_v5 = vpop.permute.xlu1 %542 }
 0x12b   :  { %770 = vmatpush3.bf16.msra.mxu1 %v767_v18 }
 0x12c   :  { %v803_v22 = vpop.eup %802  ;;  %v771_v23 = vpack.c.bf16 %v295_v20, %v294_v21 }
 0x12d   :  { %v805_v24 = vpop.eup %804  ;;  %v297_v25 = vsub.f32 %v271_v4, %v803_v22  ;;  %v538_v7 = vpop.permute.xlu0 %537 }
 0x12e   :  { %v296_v26 = vsub.f32 %v266_v6, %v805_v24  ;;  %772 = vmatprep.subr.bf16.mxu1 %v771_v23 }
 0x12f   :  { %774 = vmatpush3.bf16.msra.mxu1 %v771_v23 }
 0x130   :  { %v807_v27 = vpop.eup %806  ;;  %v775_v28 = vpack.c.bf16 %v297_v25, %v296_v26 }
 0x131   :  { %v809_v29 = vpop.eup %808  ;;  %v299_v30 = vsub.f32 %v281_v11, %v807_v27  ;;  %v558_v18 = vpop.permute.xlu0 %557 }
 0x132   :  { %v298_v31 = vsub.f32 %v276_v15, %v809_v29  ;;  %776 = vmatprep.subr.bf16.mxu1 %v775_v28  ;;  %v563_v20 = vrot.slane %v558_v18, %v562_v16 }
 0x133   :  { %778 = vmatpush3.bf16.msra.mxu1 %v775_v28 }
 0x134   :  { %v779_v32 = vpack.c.bf16 %v299_v30, %v298_v31 }
 0x136   :  { %780 = vmatprep.subr.bf16.mxu1 %v779_v32 }
 0x137   :  { %782 = vmatpush3.bf16.msra.mxu1 %v779_v32 }
 0x13a   :  { %703 = vmatmul.mubr.msk.f32.vlgmr.msra.gmra.mrb[0].mxu1 %vm328_vm2, %v301_v33 }
 0x13b   :  { %705 = vmatprep.mubr.msk.f32.mxu1 %vm328_vm2, %v302_v34 }
 0x13e   :  { %706 = vmatmul.mubr.msk.f32.gmra.mrb[2].mxu1 %vm328_vm2, %v303_v35 }
 0x13f   :  { %716 = vmatprep.mubr.msk.f32.mxu1 %vm106_vm0, %v434_v36 }
 0x20d   :  { %v704_v39 = vpop.f32.mrb[0].mxu1 }
 0x20e   :  { %v413_v40 = vadd.f32 %v704_v39, %v316_v37  ;;  %v407_v41 = vpop.f32.mrb[1].mxu1 }
 0x20f   :  { %v408_v42 = vadd.f32 %v407_v41, %v311_v38 }
 0x210   :  { %810 = vtanh.f32 %v413_v40 }
 0x211   :  { %812 = vtanh.f32 %v408_v42  ;;  %v707_v44 = vpop.f32.mrb[2].mxu1 }
 0x212   :  { %v423_v46 = vadd.f32 %v707_v44, %v326_v43  ;;  %v417_v47 = vpop.f32.mrb[3].mxu1 }
 0x213   :  { %v418_v48 = vadd.f32 %v417_v47, %v321_v45 }
 0x214   :  { %814 = vtanh.f32 %v423_v46 }
 0x215   :  { %816 = vtanh.f32 %v418_v48 }
 0x21a   :  { %v811_v49 = vpop.eup %810 }
 0x21b   :  { %v813_v50 = vpop.eup %812  ;;  %v431_v51 = vsub.f32 %v413_v40, %v811_v49 }
 0x21c   :  { %v430_v52 = vsub.f32 %v408_v42, %v813_v50 }
 0x21e   :  { %v815_v53 = vpop.eup %814  ;;  %v783_v54 = vpack.c.bf16 %v431_v51, %v430_v52 }
 0x21f   :  { %v817_v55 = vpop.eup %816  ;;  %v433_v56 = vsub.f32 %v423_v46, %v815_v53 }
 0x220   :  { %v432_v57 = vsub.f32 %v418_v48, %v817_v55  ;;  %784 = vmatprep.subr.bf16.mxu1 %v783_v54 }
 0x221   :  { %786 = vmatpush3.bf16.msra.mxu1 %v783_v54 }
 0x222   :  { %v787_v58 = vpack.c.bf16 %v433_v56, %v432_v57 }
 0x224   :  { %788 = vmatprep.subr.bf16.mxu1 %v787_v58 }
 0x225   :  { %790 = vmatpush3.bf16.msra.mxu1 %v787_v58 }
 0x228   :  { %717 = vmatmul.mubr.msk.f32.vlgmr.msra.gmra.mrb[4].mxu1 %vm106_vm0, %v435_v59 }
 0x2fb   :  { %v718_v61 = vpop.f32.mrb[4].mxu1 }
 0x2fc   :  { %v526_v63 = vadd.f32 %v718_v61, %v446_v60  ;;  %v520_v0 = vpop.f32.mrb[5].mxu1 }
 0x2fd   :  { %v521_v1 = vadd.f32 %v520_v0, %v441_v62 }
 0x2fe   :  { %818 = vtanh.f32 %v526_v63 }
 0x2ff   :  { %820 = vtanh.f32 %v521_v1 }
 0x308   :  { %v819_v2 = vpop.eup %818 }
 0x309   :  { %v821_v3 = vpop.eup %820  ;;  %v532_v4 = vsub.f32 %v526_v63, %v819_v2 }
 0x30a   :  { %v531_v6 = vsub.f32 %v521_v1, %v821_v3 }
 0x30b   :  { %v546_v8 = vmul.f32 %v543_v5, %v532_v4 }
 0x30c   :  { %v545_v9 = vmul.f32 %v538_v7, %v531_v6 }
 0x30e   :  { %v547_v11 = vadd.f32 %v546_v8, %v545_v9 }
 0x310   :  { %v548_v12 = vrot.slane %v547_v11, 4 }
 0x312   :  { %v549_v14 = vadd.f32 %v548_v12, %v547_v11 }
 0x314   :  { %v550_v15 = vrot.slane %v549_v14, 2 }
 0x316   :  { %v551_v17 = vadd.f32 %v550_v15, %v549_v14 }
 0x318   :  { %v552_v19 = vrot.slane %v551_v17, 1 }
 0x31a   :  { %v553_v21 = vadd.f32 %v552_v19, %v551_v17 }
 0x31c   :  { %v564_v22 = vadd.f32 %v563_v20, %v553_v21 }
 0x31e   :  { %565 = vst [vmem:[%s1078_s9] sm:$0x1] %v564_v22 }

</bundles_post_ra>
